<compile_context>
chip_gen: v7x
topology: tpu7x:2x2x1
jax: 0.10.0
libtpu: 0.0.40
codegen_flags: <defaults>
</compile_context>

<pallas_src>
import math

import jax
import jax.numpy as jnp
from jax.experimental import pallas as pl
from jax.experimental.pallas import tpu as pltpu

LANE = 128
SUBLANE = 8


def _quantile_regressor_kernel(x_ref, w1_ref, b1_ref, w2_ref, b2_ref, o_ref):
    """Fused MLP tile: y = relu(x @ W1t + b1) @ W2t + b2."""
    x = x_ref[...]                                                       # (TM, Din)
    h = jnp.dot(x, w1_ref[...], preferred_element_type=jnp.float32) + b1_ref[...]
    h = jnp.maximum(h, 0.0)                                              # ReLU(inplace=True)
    # Dropout(p=0) == identity, omitted.
    y = jnp.dot(h, w2_ref[...], preferred_element_type=jnp.float32) + b2_ref[...]
    o_ref[...] = y.astype(o_ref.dtype)


def quantile_regressor(x, params):
    """x: (..., d_in) float32 -> (..., 3) float32.

    params use torch layout: w1 (d_hidden, d_in), b1 (d_hidden,),
                             w2 (d_out, d_hidden), b2 (d_out,).
    """
    *lead, d_in = x.shape
    d_hidden = params["w1"].shape[0]
    d_out = params["w2"].shape[0]

    # ---- host-side prep (trace time, paid once) ----------------------------
    # Pre-transpose weights; lane-pad the output dim to a full 128-lane vreg so
    # the kernel writes unmasked full-width stores.
    d_out_pad = LANE
    w1t = params["w1"].T.astype(jnp.float32)                             # (Din, Dh)
    b1 = params["b1"].reshape(1, d_hidden).astype(jnp.float32)
    w2t = jnp.zeros((d_hidden, d_out_pad), jnp.float32).at[:, :d_out].set(
        params["w2"].T.astype(jnp.float32))
    b2 = jnp.zeros((1, d_out_pad), jnp.float32).at[0, :d_out].set(
        params["b2"].astype(jnp.float32))

    # Collapse every leading dim into one row axis -> a single (N, Din) matmul
    # chain instead of a per-batch grid loop.
    n_rows = 1
    for d in lead:
        n_rows *= d
    xf = x.reshape(n_rows, d_in).astype(jnp.float32)

    # Row tile: up to 512 rows per grid step, sublane-aligned; pad rows so the
    # grid divides evenly (padded rows are zeros and get sliced away below).
    tm = min(512, ((n_rows + SUBLANE - 1) // SUBLANE) * SUBLANE)
    n_pad = ((n_rows + tm - 1) // tm) * tm
    if n_pad != n_rows:
        xf = jnp.pad(xf, ((0, n_pad - n_rows), (0, 0)))

    grid = (n_pad // tm,)

    def resident(shape):
        # Full-array block, same block index every step (kept resident).
        return pl.BlockSpec(shape, lambda i: tuple(0 for _ in shape))

    out = pl.pallas_call(
        _quantile_regressor_kernel,
        out_shape=jax.ShapeDtypeStruct((n_pad, d_out_pad), jnp.float32),
        grid_spec=pltpu.PrefetchScalarGridSpec(
            num_scalar_prefetch=0,
            grid=grid,
            in_specs=[
                pl.BlockSpec((tm, d_in), lambda i: (i, 0)),   # x row-tile
                resident((d_in, d_hidden)),                   # W1^T
                resident((1, d_hidden)),                      # b1
                resident((d_hidden, d_out_pad)),              # W2^T (lane-padded)
                resident((1, d_out_pad)),                     # b2   (lane-padded)
            ],
            out_specs=pl.BlockSpec((tm, d_out_pad), lambda i: (i, 0)),
        ),
        compiler_params=pltpu.CompilerParams(
            dimension_semantics=("parallel",)),
    )(xf, w1t, b1, w2t, b2)

    # Strip row padding and the lane padding of the output dim.
    return out[:n_rows, :d_out].reshape(*lead, d_out)


def _reference(x, params):
    """Pure-JAX mirror of QuantileRegressor.forward (dropout=0 -> identity)."""
    h = x @ params["w1"].T + params["b1"]
    h = jnp.maximum(h, 0.0)
    return h @ params["w2"].T + params["b2"]


def make_params(key, d_in, d_hidden, d_out=3, bias_init=0.0):
    """Deterministic synthetic params matching the torch module's layout."""
    k1, k2, k3 = jax.random.split(key, 3)
    s1 = 1.0 / math.sqrt(d_in)
    s2 = 1.0 / math.sqrt(d_hidden)
    return {
        "w1": jax.random.uniform(k1, (d_hidden, d_in), minval=-s1, maxval=s1,
                                 dtype=jnp.float32),
        "b1": jax.random.uniform(k2, (d_hidden,), minval=-s1, maxval=s1,
                                 dtype=jnp.float32),
        "w2": jax.random.uniform(k3, (d_out, d_hidden), minval=-s2, maxval=s2,
                                 dtype=jnp.float32),
        # nn.init.constant_(self.fc_2.bias.data, bias) with bias=0
        "b2": jnp.full((d_out,), bias_init, dtype=jnp.float32),
    }


if __name__ == "__main__":
    BATCH, SEQ, D_IN, D_HIDDEN = 2, 8, 32, 64

    key = jax.random.PRNGKey(0)
    k_x, k_p = jax.random.split(key)
    x = jax.random.normal(k_x, (BATCH, SEQ, D_IN), dtype=jnp.float32)
    params = make_params(k_p, D_IN, D_HIDDEN)

    out = quantile_regressor(x, params)
    out = jax.block_until_ready(out)

    ref = _reference(x, params)
    assert out.shape == (BATCH, SEQ, 3), f"bad shape {out.shape}"
    assert jnp.allclose(out, ref, atol=1e-5, rtol=1e-5), "mismatch vs reference"

    print("KERNEL_OK")
</pallas_src>

<mosaic_0001>
module attributes {stable_mosaic.version = 11 : i64} {
  func.func @_quantile_regressor_kernel(%arg0: i32, %arg1: memref<16x32xf32, #tpu.memory_space<vmem>>, %arg2: memref<32x64xf32, #tpu.memory_space<vmem>>, %arg3: memref<1x64xf32, #tpu.memory_space<vmem>>, %arg4: memref<64x128xf32, #tpu.memory_space<vmem>>, %arg5: memref<1x128xf32, #tpu.memory_space<vmem>>, %arg6: memref<16x128xf32, #tpu.memory_space<vmem>>) attributes {dimension_semantics = [#tpu.dimension_semantics<parallel>], iteration_bounds = array<i64: 1>, scalar_prefetch = 0 : i64, scratch_operands = 0 : i64, tpu.core_type = #tpu.core_type<tc>, window_params = [{transform_indices = @transform_0, window_bounds = array<i64: 16, 32>}, {pipeline_mode = #tpu.pipeline_mode<synchronous>, transform_indices = @transform_1, window_bounds = array<i64: 32, 64>}, {pipeline_mode = #tpu.pipeline_mode<synchronous>, transform_indices = @transform_2, window_bounds = array<i64: 1, 64>}, {pipeline_mode = #tpu.pipeline_mode<synchronous>, transform_indices = @transform_3, window_bounds = array<i64: 64, 128>}, {pipeline_mode = #tpu.pipeline_mode<synchronous>, transform_indices = @transform_4, window_bounds = array<i64: 1, 128>}, {transform_indices = @transform_5, window_bounds = array<i64: 16, 128>}]} {
    %c0 = arith.constant 0 : index
    %c0_0 = arith.constant 0 : index
    %0 = vector.load %arg1[%c0, %c0_0] : memref<16x32xf32, #tpu.memory_space<vmem>>, vector<16x32xf32>
    %c0_1 = arith.constant 0 : index
    %c0_2 = arith.constant 0 : index
    %1 = vector.load %arg2[%c0_1, %c0_2] : memref<32x64xf32, #tpu.memory_space<vmem>>, vector<32x64xf32>
    %cst = arith.constant dense<0.000000e+00> : vector<16x64xf32>
    %2 = tpu.matmul %0, %1, %cst {dimension_numbers = #tpu.dot_dimension_numbers<[1], [0], [0], [1], [0, 0, 1, 1], [], []>} : vector<16x32xf32>, vector<32x64xf32>, vector<16x64xf32> -> vector<16x64xf32>
    %c0_3 = arith.constant 0 : index
    %c0_4 = arith.constant 0 : index
    %3 = vector.load %arg3[%c0_3, %c0_4] : memref<1x64xf32, #tpu.memory_space<vmem>>, vector<1x64xf32>
    %4 = vector.broadcast %3 : vector<1x64xf32> to vector<16x64xf32>
    %5 = arith.addf %2, %4 : vector<16x64xf32>
    %cst_5 = arith.constant 0.000000e+00 : f32
    %6 = vector.broadcast %cst_5 : f32 to vector<16x64xf32>
    %7 = arith.maximumf %5, %6 : vector<16x64xf32>
    %c0_6 = arith.constant 0 : index
    %c0_7 = arith.constant 0 : index
    %8 = vector.load %arg4[%c0_6, %c0_7] : memref<64x128xf32, #tpu.memory_space<vmem>>, vector<64x128xf32>
    %cst_8 = arith.constant dense<0.000000e+00> : vector<16x128xf32>
    %9 = tpu.matmul %7, %8, %cst_8 {dimension_numbers = #tpu.dot_dimension_numbers<[1], [0], [0], [1], [0, 0, 1, 1], [], []>} : vector<16x64xf32>, vector<64x128xf32>, vector<16x128xf32> -> vector<16x128xf32>
    %c0_9 = arith.constant 0 : index
    %c0_10 = arith.constant 0 : index
    %10 = vector.load %arg5[%c0_9, %c0_10] : memref<1x128xf32, #tpu.memory_space<vmem>>, vector<1x128xf32>
    %11 = vector.broadcast %10 : vector<1x128xf32> to vector<16x128xf32>
    %12 = arith.addf %9, %11 : vector<16x128xf32>
    %c0_11 = arith.constant 0 : index
    %c0_12 = arith.constant 0 : index
    %13 = vector.load %arg6[%c0_11, %c0_12] : memref<16x128xf32, #tpu.memory_space<vmem>>, vector<16x128xf32>
    tpu.vector_store %arg6[%c0_11, %c0_12], %12 {strides = array<i32>} : memref<16x128xf32, #tpu.memory_space<vmem>>, vector<16x128xf32>,
    return
  }
  func.func @transform_0(%arg0: i32) -> (i32, i32) {
    %c0_i32 = arith.constant 0 : i32
    %c0_i32_0 = arith.constant 0 : i32
    return %arg0, %c0_i32 : i32, i32
  }
  func.func @transform_1(%arg0: i32) -> (i32, i32) {
    %c0_i32 = arith.constant 0 : i32
    %c0_i32_0 = arith.constant 0 : i32
    %c0_i32_1 = arith.constant 0 : i32
    return %c0_i32, %c0_i32_0 : i32, i32
  }
  func.func @transform_2(%arg0: i32) -> (i32, i32) {
    %c0_i32 = arith.constant 0 : i32
    %c0_i32_0 = arith.constant 0 : i32
    %c0_i32_1 = arith.constant 0 : i32
    return %c0_i32, %c0_i32_0 : i32, i32
  }
  func.func @transform_3(%arg0: i32) -> (i32, i32) {
    %c0_i32 = arith.constant 0 : i32
    %c0_i32_0 = arith.constant 0 : i32
    %c0_i32_1 = arith.constant 0 : i32
    return %c0_i32, %c0_i32_0 : i32, i32
  }
  func.func @transform_4(%arg0: i32) -> (i32, i32) {
    %c0_i32 = arith.constant 0 : i32
    %c0_i32_0 = arith.constant 0 : i32
    %c0_i32_1 = arith.constant 0 : i32
    return %c0_i32, %c0_i32_0 : i32, i32
  }
  func.func @transform_5(%arg0: i32) -> (i32, i32) {
    %c0_i32 = arith.constant 0 : i32
    %c0_i32_0 = arith.constant 0 : i32
    return %arg0, %c0_i32 : i32, i32
  }
}

</mosaic_0001>

<bundles_post_ra>
// kernel: tpu_custom_call.1
= control target key start
LH: loop header
LB: loop body
LE: loop exit
PB: predicated region body
PF: predicated region fallthrough
CT: control target
= control target key end

     0   :  { %10 = vsyncpa [#allocation3], 0  ;;  %s563_s0 = inlined_call_operand.hbm [shape: f32[16,32], index: 0, kind: input, shape index: {}]   ;;  %s564_s1 = inlined_call_operand.hbm [shape: f32[32,64], index: 1, kind: input, shape index: {}]   ;;  %s565_s2 = inlined_call_operand.vmem [shape: f32[1,64], index: 2, kind: input, shape index: {}]   ;;  %s566_s3 = inlined_call_operand.hbm [shape: f32[64,128], index: 3, kind: input, shape index: {}]   ;;  %s567_s4 = inlined_call_operand.vmem [shape: f32[1,128], index: 4, kind: input, shape index: {}]   ;;  %s568_s5 = inlined_call_operand.hbm [shape: f32[16,128], index: 5, kind: output, shape index: {}]  }
   0x1   :  { %11 = vsyncpa [#allocation6], 0 }
   0x2   :  { %12 = vsyncpa [#allocation4], 0  ;;  %s452_s18 = smov [#allocation5]   ;;  %s453_s20 = smov [#allocation2]  }
   0x3   :  { %s30_s19 = sshll.u32 %s452_s18, 4  ;;  %s18_s21 = sshll.u32 %s453_s20, 4  ;;  %s31_s19 = int_to_ptr.vmem [resolvable:$true] %s30_s19  ;;  %s488_s21 = int_to_ptr.vmem [resolvable:$true] %s18_s21 }
   0x4   :  { %s358_s24 = scalar_lea.hbm %s564_s1, 512 }
   0x5   :  { %p359_p0 = scmp.ne.s32.totalorder %s564_s1, %s358_s24  ;;  %p362_p1 = scmp.lt.u32.totalorder %s358_s24, %s564_s1 }
   0x7   :  { %p364_p2 = pnand %p362_p1, %p359_p0 }
   0x9   :  { %367 = shalt.err (!%p364_p2)
}
   0xa   :  { %s368_s29 = scalar_lea.vmem %s31_s19, 512  ;;  %p373_p4 = scmp.lt.s32.totalorder %s31_s19, %s31_s19 }
   0xb   :  { %p369_p3 = scmp.ne.s32.totalorder %s31_s19, %s368_s29  ;;  %p374_p5 = scmp.lt.s32.totalorder %s368_s29, %s368_s29 }
   0xd   :  { %p375_p6 = por %p374_p5, %p373_p4 }
   0xf   :  { %p376_p7 = pnand %p375_p6, %p369_p3 }
  0x11   :  { %379 = shalt.err (!%p376_p7)
}
  0x12   :  { %s454_s30 = smov 128   ;;  %s455_s6 = smov 8  }
  0x13   :  { %36 = dma.hbm_to_vmem [thread:$0]  %s564_s1, 512, %s31_s19, [#allocation6], %s454_s30, %s454_s30, %s455_s6  }
  0x14   :  { %s380_s11 = scalar_lea.hbm %s563_s0, 256 }
  0x15   :  { %p381_p8 = scmp.ne.s32.totalorder %s563_s0, %s380_s11  ;;  %p384_p9 = scmp.lt.u32.totalorder %s380_s11, %s563_s0 }
  0x17   :  { %p386_p10 = pnand %p384_p9, %p381_p8 }
  0x19   :  { %389 = shalt.err (!%p386_p10)
}
  0x1a   :  { %s390_s16 = scalar_lea.vmem %s488_s21, 256  ;;  %p395_p12 = scmp.lt.s32.totalorder %s488_s21, %s488_s21 }
  0x1b   :  { %p391_p11 = scmp.ne.s32.totalorder %s488_s21, %s390_s16  ;;  %p396_p13 = scmp.lt.s32.totalorder %s390_s16, %s390_s16 }
  0x1d   :  { %p397_p0 = por %p396_p13, %p395_p12 }
  0x1f   :  { %p398_p1 = pnand %p397_p0, %p391_p11 }
  0x21   :  { %401 = shalt.err (!%p398_p1)
}
  0x22   :  { %24 = dma.hbm_to_vmem [thread:$0]  %s563_s0, 256, %s488_s21, [#allocation3], %s454_s30, %s454_s30, %s455_s6  }
  0x23   :  { %s456_s18 = smov [#allocation7]   ;;  %s402_s23 = scalar_lea.hbm %s566_s3, 1024 }
  0x24   :  { %s44_s19 = sshll.u32 %s456_s18, 4  ;;  %p403_p2 = scmp.ne.s32.totalorder %s566_s3, %s402_s23  ;;  %s45_s19 = int_to_ptr.vmem [resolvable:$true] %s44_s19 }
  0x25   :  { %p406_p3 = scmp.lt.u32.totalorder %s402_s23, %s566_s3 }
  0x27   :  { %p408_p4 = pnand %p406_p3, %p403_p2 }
  0x29   :  { %411 = shalt.err (!%p408_p4)
}
  0x2a   :  { %s412_s28 = scalar_lea.vmem %s45_s19, 1024  ;;  %p417_p6 = scmp.lt.s32.totalorder %s45_s19, %s45_s19 }
  0x2b   :  { %p413_p5 = scmp.ne.s32.totalorder %s45_s19, %s412_s28  ;;  %p418_p7 = scmp.lt.s32.totalorder %s412_s28, %s412_s28 }
  0x2d   :  { %p419_p8 = por %p418_p7, %p417_p6 }
  0x2f   :  { %p420_p9 = pnand %p419_p8, %p413_p5 }
  0x31   :  { %423 = shalt.err (!%p420_p9)
}
  0x32   :  { %50 = dma.hbm_to_vmem [thread:$0]  %s566_s3, 1024, %s45_s19, [#allocation6], %s454_s30, %s454_s30, %s455_s6  }
  0x33   :  { %446 = dma.done.wait [#allocation3], 256  }
  0x34   :  { %447 = vsyncadd [#allocation3], 4294967040 }
  0x35   :  { %448 = dma.done.wait [#allocation6], 1536  }
  0x36   :  { %449 = vsyncadd [#allocation6], 4294965760  ;;  %vm75_vm0 = vcmask 261120   ;;  %v64_v0 = vld [vmem:[#allocation5] sm:$0xff]  ;;  %v65_v1 = vld [vmem:[#allocation5 + $0x8] sm:$0xff]  ;;  %vm174_vm1 = vcmask 523264  }
  0x37   :  { %v66_v2 = vld [vmem:[#allocation5 + $0x10] sm:$0xff]  ;;  %v328_v3 = vpack.c.bf16 %v65_v1, %v64_v0  ;;  %v67_v4 = vld [vmem:[#allocation5 + $0x18] sm:$0xff]  ;;  %v159_v7 = vld [vmem:[#allocation7] sm:$0xff]  ;;  %s457_s9 = smov [#allocation8]  }
  0x38   :  { %v62_v5 = vld [vmem:[#allocation2] sm:$0xff]  ;;  %v332_v6 = vpack.c.bf16 %v67_v4, %v66_v2  ;;  %v160_v8 = vld [vmem:[#allocation7 + $0x8] sm:$0xff]  ;;  %v162_v11 = vld [vmem:[#allocation7 + $0x18] sm:$0xff]  ;;  %s263_s10 = sshll.u32 %s457_s9, 4  ;;  %s264_s10 = int_to_ptr.vmem [resolvable:$true] %s263_s10 }
  0x39   :  { %306 = vmatprep.mubr.msk.f32.mxu0 %vm75_vm0, %v62_v5  ;;  %v161_v9 = vld [vmem:[#allocation7 + $0x10] sm:$0xff]  ;;  %329 = vmatprep.subr.bf16.mxu0 %v328_v3  ;;  %v336_v10 = vpack.c.bf16 %v160_v8, %v159_v7  ;;  %v163_v13 = vld [vmem:[#allocation7 + $0x20] sm:$0xff]  ;;  %v164_v14 = vld [vmem:[#allocation7 + $0x28] sm:$0xff]  ;;  %p429_p11 = scmp.lt.s32.totalorder %s264_s10, %s264_s10 }
  0x3a   :  { %331 = vmatpush3.bf16.msra.mxu0 %v328_v3  ;;  %v340_v12 = vpack.c.bf16 %v162_v11, %v161_v9  ;;  %v344_v15 = vpack.c.bf16 %v164_v14, %v163_v13  ;;  %v63_v16 = vld [vmem:[#allocation2 + $0x8] sm:$0xff]  ;;  %v165_v17 = vld [vmem:[#allocation7 + $0x30] sm:$0xff] }
  0x3b   :  { %333 = vmatprep.subr.bf16.mxu0 %v332_v6  ;;  %337 = vmatprep.subr.bf16.mxu1 %v336_v10  ;;  %v166_v18 = vld [vmem:[#allocation7 + $0x38] sm:$0xff]  ;;  %v276_v20 = vld [vmem:[%s565_s2] ss:$0 sm:$0xff]  ;;  %s424_s2 = scalar_lea.vmem %s264_s10, 256 }
  0x3c   :  { %339 = vmatpush3.bf16.msra.mxu1 %v336_v10  ;;  %v348_v19 = vpack.c.bf16 %v166_v18, %v165_v17  ;;  %v279_v27 = vld [vmem:[%s567_s4] ss:$0 sm:$0xff]  ;;  %p425_p10 = scmp.ne.s32.totalorder %s264_s10, %s424_s2  ;;  %p430_p12 = scmp.lt.s32.totalorder %s424_s2, %s424_s2 }
  0x3d   :  { %341 = vmatprep.subr.bf16.mxu1 %v340_v12 }
  0x3e   :  { %335 = vmatpush3.bf16.msra.mxu0 %v332_v6  ;;  %p431_p13 = por %p430_p12, %p429_p11 }
  0x40   :  { %343 = vmatpush3.bf16.msra.mxu1 %v340_v12  ;;  %p432_p0 = pnand %p431_p13, %p425_p10 }
  0x41   :  { %307 = vmatmul.mubr.msk.f32.vlgmr.msra.gmra.mrb[0].mxu0 %vm75_vm0, %v63_v16  ;;  %345 = vmatprep.subr.bf16.mxu1 %v344_v15 }
  0x44   :  { %347 = vmatpush3.bf16.msra.mxu1 %v344_v15 }
  0x45   :  { %349 = vmatprep.subr.bf16.mxu1 %v348_v19 }
  0x48   :  { %351 = vmatpush3.bf16.msra.mxu1 %v348_v19 }
 0x114   :  { %v308_v21 = vpop.f32.mrb[0].mxu0 }
 0x115   :  { %v154_v22 = vadd.f32 %v308_v21, %v276_v20  ;;  %v148_v23 = vpop.f32.mrb[1].mxu0 }
 0x116   :  { %v149_v24 = vadd.f32 %v276_v20, %v148_v23 }
 0x117   :  { %v158_v26 = vmax.f32 %v154_v22, 0.0 }
 0x118   :  { %v157_v25 = vmax.f32 %v149_v24, 0.0 }
 0x11a   :  { %325 = vmatprep.mubr.msk.f32.mxu1 %vm174_vm1, %v157_v25 }
 0x11b   :  { %326 = vmatmul.mubr.msk.f32.vlgmr.msra.gmra.mrb[0].mxu1 %vm174_vm1, %v158_v26 }
 0x1ee   :  { %v327_v28 = vpop.f32.mrb[0].mxu1 }
 0x1ef   :  { %v253_v29 = vadd.f32 %v327_v28, %v279_v27  ;;  %v247_v30 = vpop.f32.mrb[1].mxu1 }
 0x1f0   :  { %v248_v31 = vadd.f32 %v279_v27, %v247_v30 }
 0x1f1   :  { %257 = vst [vmem:[#allocation8 + $0x8] sm:$0xff] %v253_v29 }
 0x1f2   :  { %256 = vst [vmem:[#allocation8] sm:$0xff] %v248_v31 }
 0x1f3   :  { %435 = shalt.err (!%p432_p0)
}
 0x1f4   :  { %s436_s4 = scalar_lea.hbm %s568_s5, 256 }
 0x1f5   :  { %p437_p1 = scmp.ne.s32.totalorder %s568_s5, %s436_s4  ;;  %p440_p2 = scmp.lt.u32.totalorder %s436_s4, %s568_s5 }
 0x1f7   :  { %p442_p3 = pnand %p440_p2, %p437_p1 }
 0x1f9   :  { %445 = shalt.err (!%p442_p3)
}
 0x1fa   :  { %269 = dma.vmem_to_hbm [thread:$0]  %s264_s10, 256, %s568_s5, [#allocation4], %s454_s30, %s454_s30, %s455_s6  }
 0x1fb   :  { %450 = dma.done.wait [#allocation4], 256  }
 0x1fc   :  { %451 = vsyncadd [#allocation4], 4294967040 }
 0x1fd   :  { %273 = vsyncpa [#allocation3], 1 }
 0x1fe   :  { %274 = vsyncpa [#allocation6], 1 }
 0x1ff   :  { %275 = vsyncpa [#allocation4], 1 }

</bundles_post_ra>
